<compile_context>
chip_gen: v7x
topology: tpu7x:2x2x1
jax: 0.10.0
libtpu: 0.0.40
codegen_flags: <defaults>
</compile_context>

<pallas_src>
import functools
import math

import jax
import jax.numpy as jnp
from jax.experimental import pallas as pl
from jax.experimental.pallas import tpu as pltpu

LANES = 128
SUBLANES = 8


def _cdiv(a, b):
    return -(-a // b)


def _round_up(v, m):
    return _cdiv(v, m) * m


def _chip_config():
    """Per-generation tiling / core-split choices."""
    try:
        kind = jax.devices()[0].device_kind.lower()
    except Exception:  # pragma: no cover - defensive
        kind = ""
    if "v7" in kind or "7x" in kind:
        # 2 TensorCores/chip, 64 MiB VMEM per TC, VALU-bound kernel:
        # split the block loop across cores, moderate block size.
        return dict(core_split=2, block_rows=1024,
                    vmem_bytes=32 * 1024 * 1024, core_sem=pltpu.CORE_PARALLEL)
    if "v5" in kind or "v6" in kind:
        # Single TC, 128 MiB VMEM: big blocks to ride the HBM roofline (v5e).
        return dict(core_split=1, block_rows=2048,
                    vmem_bytes=64 * 1024 * 1024, core_sem=pltpu.ARBITRARY)
    # Unknown / older chip: conservative settings (matches previous version).
    return dict(core_split=1, block_rows=1024,
                vmem_bytes=32 * 1024 * 1024, core_sem=pltpu.ARBITRARY)


def _focal_kernel(x_ref, t_ref, out_ref, acc_pos_ref, acc_neg_ref, *,
                  gamma, smooth, rows, block_rows, fold_rows, bpc, needs_mask):
    p = pl.program_id(0)                 # core-split axis
    i = pl.program_id(1)                 # sequential reduction axis
    n_steps = pl.num_programs(1)

    @pl.when(i == 0)
    def _():
        acc_pos_ref[...] = jnp.zeros_like(acc_pos_ref)
        acc_neg_ref[...] = jnp.zeros_like(acc_neg_ref)

    x = x_ref[...].astype(jnp.float32)
    t = t_ref[...].astype(jnp.float32)

    log_lo = math.log(smooth)
    log_hi = math.log1p(-smooth)

    # Stable log-sigmoid pair; clipping in log-space == clipping the prob.
    l1pe = jnp.log1p(jnp.exp(-jnp.abs(x)))          # log(1 + e^{-|x|})
    log_p = jnp.minimum(x, 0.0) - l1pe              # log(sigmoid(x))
    log_np = -jnp.maximum(x, 0.0) - l1pe            # log(sigmoid(-x)) = log(1-p)
    log_p_c = jnp.clip(log_p, log_lo, log_hi)       # log(clip(p))
    log_np_c = jnp.clip(log_np, log_lo, log_hi)     # log(clip(1-p))

    # Focal weights via EUP exp -- no f32 divide, no jnp.power.
    w_pos = jnp.exp(gamma * log_np_c)               # (1 - clip(p))^gamma
    w_neg = jnp.exp(gamma * log_p_c)                # clip(p)^gamma

    # Unscaled contributions; (-1) and (-alpha) are applied once in the wrapper.
    pos = jnp.where(t == 1.0, w_pos * log_p_c, 0.0)
    neg = jnp.where(t == 0.0, w_neg * log_np, 0.0)  # unclipped logsigmoid(-x)

    def fold(v):
        r = v[0:fold_rows, :]
        for k in range(1, block_rows // fold_rows):
            r = r + v[k * fold_rows:(k + 1) * fold_rows, :]
        return r

    if needs_mask:
        # Valid rows inside this (possibly partial / duplicate) virtual block.
        rows_here = rows - (p * bpc + i) * block_rows

        @pl.when(rows_here >= block_rows)            # fast path: full block
        def _():
            acc_pos_ref[...] += fold(pos)
            acc_neg_ref[...] += fold(neg)

        @pl.when(rows_here < block_rows)             # ragged / duplicate block
        def _():
            row_ids = jax.lax.broadcasted_iota(jnp.int32, (block_rows, LANES), 0)
            valid = row_ids < rows_here
            acc_pos_ref[...] += fold(jnp.where(valid, pos, 0.0))
            acc_neg_ref[...] += fold(jnp.where(valid, neg, 0.0))
    else:
        acc_pos_ref[...] += fold(pos)
        acc_neg_ref[...] += fold(neg)

    @pl.when(i == n_steps - 1)
    def _():
        out_ref[0, :, :] = acc_pos_ref[...]
        out_ref[1, :, :] = acc_neg_ref[...]


def _xla_terms(x, t, gamma, smooth):
    """Unscaled pos/neg sums for a tiny (<128 elem) tail, in plain XLA."""
    x = x.astype(jnp.float32)
    t = t.astype(jnp.float32)
    l1pe = jnp.log1p(jnp.exp(-jnp.abs(x)))
    log_p = jnp.minimum(x, 0.0) - l1pe
    log_np = -jnp.maximum(x, 0.0) - l1pe
    lo, hi = math.log(smooth), math.log1p(-smooth)
    log_p_c = jnp.clip(log_p, lo, hi)
    log_np_c = jnp.clip(log_np, lo, hi)
    pos = jnp.where(t == 1.0, jnp.exp(gamma * log_np_c) * log_p_c, 0.0)
    neg = jnp.where(t == 0.0, jnp.exp(gamma * log_p_c) * log_np, 0.0)
    return jnp.sum(pos), jnp.sum(neg)


def binary_focal_loss(output, target, alpha=3.0, gamma=2.0, smooth=1e-6):
    """Matches BinaryFocalLoss(alpha=3, gamma=2, ignore_index=None, 'mean')."""
    # TODO(synk): ignore_index and reduction in {'none', 'sum'} not implemented
    # (module defaults ignore_index=None, reduction='mean' are used).
    assert output.shape == target.shape
    alpha = float(alpha)
    gamma = float(gamma)
    smooth = float(smooth)
    n = output.size

    x = output.reshape(-1)
    t = target.reshape(-1)

    rows = n // LANES
    tail = n - rows * LANES

    pos_sum = jnp.float32(0.0)
    neg_sum = jnp.float32(0.0)

    if rows > 0:
        if tail:
            # TODO(synk): XLA may materialize this prefix slice; only hit when
            # numel % 128 != 0 (the full-array pad copy is avoided entirely).
            x_main = x[: rows * LANES]
            t_main = t[: rows * LANES]
        else:
            x_main, t_main = x, t
        x2 = x_main.reshape(rows, LANES)
        t2 = t_main.reshape(rows, LANES)

        cfg = _chip_config()
        block_rows = min(cfg["block_rows"], _round_up(rows, SUBLANES))
        fold_rows = math.gcd(block_rows, 64)           # small accumulator shape
        total_blocks = _cdiv(rows, block_rows)
        core_split = min(cfg["core_split"], total_blocks)
        bpc = _cdiv(total_blocks, core_split)          # blocks per core
        last_block = total_blocks - 1
        # Mask code is only emitted if a partial or duplicate block can exist.
        needs_mask = (rows % block_rows != 0) or (core_split * bpc != total_blocks)

        def in_index(pc, ib):
            # Clamp overhanging virtual blocks; the in-kernel mask zeroes them.
            return (jnp.minimum(pc * bpc + ib, last_block), 0)

        kernel = functools.partial(
            _focal_kernel, gamma=gamma, smooth=smooth, rows=rows,
            block_rows=block_rows, fold_rows=fold_rows, bpc=bpc,
            needs_mask=needs_mask)

        dim_sems = (cfg["core_sem"] if core_split > 1 else pltpu.ARBITRARY,
                    pltpu.ARBITRARY)

        partials = pl.pallas_call(
            kernel,
            out_shape=jax.ShapeDtypeStruct((core_split * 2, fold_rows, LANES),
                                           jnp.float32),
            grid_spec=pltpu.PrefetchScalarGridSpec(
                num_scalar_prefetch=0,
                grid=(core_split, bpc),
                in_specs=[
                    pl.BlockSpec((block_rows, LANES), in_index),
                    pl.BlockSpec((block_rows, LANES), in_index),
                ],
                out_specs=pl.BlockSpec((2, fold_rows, LANES),
                                       lambda pc, ib: (pc, 0, 0)),
                scratch_shapes=[
                    pltpu.VMEM((fold_rows, LANES), jnp.float32),  # acc_pos
                    pltpu.VMEM((fold_rows, LANES), jnp.float32),  # acc_neg
                ],
            ),
            compiler_params=pltpu.CompilerParams(
                dimension_semantics=dim_sems,
                vmem_limit_bytes=cfg["vmem_bytes"],
            ),
        )(x2, t2)

        pos_sum = pos_sum + jnp.sum(partials[0::2])
        neg_sum = neg_sum + jnp.sum(partials[1::2])

    if tail:
        tp, tn = _xla_terms(x[rows * LANES:], t[rows * LANES:], gamma, smooth)
        pos_sum = pos_sum + tp
        neg_sum = neg_sum + tn

    total = -(pos_sum + jnp.float32(alpha) * neg_sum)
    return total / jnp.float32(n)          # reduction='mean'


def _reference(output, target, alpha=3.0, gamma=2.0, smooth=1e-6):
    prob = jax.nn.sigmoid(output.astype(jnp.float32))
    prob = jnp.clip(prob, smooth, 1.0 - smooth)
    tgt = target.astype(jnp.float32)
    pos_mask = (tgt == 1.0).astype(jnp.float32)
    neg_mask = (tgt == 0.0).astype(jnp.float32)
    pos_loss = -pos_mask * jnp.power(1.0 - prob, gamma) * jnp.log(prob)
    neg_loss = (-alpha * neg_mask * jnp.power(prob, gamma)
                * jax.nn.log_sigmoid(-output.astype(jnp.float32)))
    return jnp.mean(pos_loss + neg_loss)


if __name__ == "__main__":
    key = jax.random.PRNGKey(0)
    k1, k2, k3, k4 = jax.random.split(key, 4)

    loss_fn = jax.jit(binary_focal_loss)

    # NCHW: batch=2, channels=4, spatial=16x16 (numel % 128 == 0 fast path).
    shape = (2, 4, 16, 16)
    output = jax.random.normal(k1, shape, dtype=jnp.float32) * 2.0
    target = jax.random.bernoulli(k2, 0.5, shape).astype(jnp.float32)
    loss = jax.block_until_ready(loss_fn(output, target))
    ref = _reference(output, target)
    assert jnp.allclose(loss, ref, rtol=2e-5, atol=1e-6), (loss, ref)

    # Ragged shape: exercises the partial-block mask path and the <128 tail.
    shape2 = (2, 3, 7, 11)
    output2 = jax.random.normal(k3, shape2, dtype=jnp.float32) * 2.0
    target2 = jax.random.bernoulli(k4, 0.5, shape2).astype(jnp.float32)
    loss2 = jax.block_until_ready(loss_fn(output2, target2))
    ref2 = _reference(output2, target2)
    assert jnp.allclose(loss2, ref2, rtol=2e-5, atol=1e-6), (loss2, ref2)

    print("KERNEL_OK")
</pallas_src>

<mosaic_0001>
module attributes {stable_mosaic.version = 11 : i64} {
  func.func @_focal_kernel(%arg0: i32, %arg1: i32, %arg2: memref<16x128xf32, #tpu.memory_space<vmem>>, %arg3: memref<16x128xf32, #tpu.memory_space<vmem>>, %arg4: memref<2x16x128xf32, #tpu.memory_space<vmem>>, %arg5: memref<16x128xf32, #tpu.memory_space<vmem>>, %arg6: memref<16x128xf32, #tpu.memory_space<vmem>>) attributes {dimension_semantics = [#tpu.dimension_semantics<arbitrary>, #tpu.dimension_semantics<arbitrary>], iteration_bounds = array<i64: 1, 1>, scalar_prefetch = 0 : i64, scratch_operands = 2 : i64, tpu.core_type = #tpu.core_type<tc>, window_params = [{transform_indices = @transform_0, window_bounds = array<i64: 16, 128>}, {transform_indices = @transform_1, window_bounds = array<i64: 16, 128>}, {transform_indices = @transform_2, window_bounds = array<i64: 2, 16, 128>}]} {
    %c0_i32 = arith.constant 0 : i32
    %0 = arith.cmpi eq, %arg1, %c0_i32 : i32
    %1 = arith.extui %0 : i1 to i32
    %c0_i32_0 = arith.constant 0 : i32
    %2 = arith.cmpi ne, %1, %c0_i32_0 : i32
    scf.if %2 {
      %cst_27 = arith.constant 0.000000e+00 : f32
      %51 = vector.broadcast %cst_27 : f32 to vector<16x128xf32>
      %c0_28 = arith.constant 0 : index
      %c0_29 = arith.constant 0 : index
      %52 = vector.load %arg5[%c0_28, %c0_29] : memref<16x128xf32, #tpu.memory_space<vmem>>, vector<16x128xf32>
      tpu.vector_store %arg5[%c0_28, %c0_29], %51 {strides = array<i32>} : memref<16x128xf32, #tpu.memory_space<vmem>>, vector<16x128xf32>,
      %cst_30 = arith.constant 0.000000e+00 : f32
      %53 = vector.broadcast %cst_30 : f32 to vector<16x128xf32>
      %c0_31 = arith.constant 0 : index
      %c0_32 = arith.constant 0 : index
      %54 = vector.load %arg6[%c0_31, %c0_32] : memref<16x128xf32, #tpu.memory_space<vmem>>, vector<16x128xf32>
      tpu.vector_store %arg6[%c0_31, %c0_32], %53 {strides = array<i32>} : memref<16x128xf32, #tpu.memory_space<vmem>>, vector<16x128xf32>,
    } else {
    }
    %c0 = arith.constant 0 : index
    %c0_1 = arith.constant 0 : index
    %3 = vector.load %arg2[%c0, %c0_1] : memref<16x128xf32, #tpu.memory_space<vmem>>, vector<16x128xf32>
    %c0_2 = arith.constant 0 : index
    %c0_3 = arith.constant 0 : index
    %4 = vector.load %arg3[%c0_2, %c0_3] : memref<16x128xf32, #tpu.memory_space<vmem>>, vector<16x128xf32>
    %5 = math.absf %3 : vector<16x128xf32>
    %cst = arith.constant 0.000000e+00 : f32
    %6 = vector.broadcast %cst : f32 to vector<16x128xf32>
    %7 = arith.subf %6, %5 : vector<16x128xf32>
    %8 = math.exp %7 : vector<16x128xf32>
    %9 = math.log1p %8 : vector<16x128xf32>
    %cst_4 = arith.constant 0.000000e+00 : f32
    %10 = vector.broadcast %cst_4 : f32 to vector<16x128xf32>
    %11 = arith.minimumf %3, %10 : vector<16x128xf32>
    %12 = arith.subf %11, %9 : vector<16x128xf32>
    %cst_5 = arith.constant 0.000000e+00 : f32
    %13 = vector.broadcast %cst_5 : f32 to vector<16x128xf32>
    %14 = arith.maximumf %3, %13 : vector<16x128xf32>
    %cst_6 = arith.constant 0.000000e+00 : f32
    %15 = vector.broadcast %cst_6 : f32 to vector<16x128xf32>
    %16 = arith.subf %15, %14 : vector<16x128xf32>
    %17 = arith.subf %16, %9 : vector<16x128xf32>
    %cst_7 = arith.constant -13.8155107 : f32
    %cst_8 = arith.constant -1.00000045E-6 : f32
    %18 = vector.broadcast %cst_7 : f32 to vector<16x128xf32>
    %19 = arith.maximumf %18, %12 : vector<16x128xf32>
    %20 = vector.broadcast %cst_8 : f32 to vector<16x128xf32>
    %21 = arith.minimumf %20, %19 : vector<16x128xf32>
    %cst_9 = arith.constant -13.8155107 : f32
    %cst_10 = arith.constant -1.00000045E-6 : f32
    %22 = vector.broadcast %cst_9 : f32 to vector<16x128xf32>
    %23 = arith.maximumf %22, %17 : vector<16x128xf32>
    %24 = vector.broadcast %cst_10 : f32 to vector<16x128xf32>
    %25 = arith.minimumf %24, %23 : vector<16x128xf32>
    %cst_11 = arith.constant 2.000000e+00 : f32
    %26 = vector.broadcast %cst_11 : f32 to vector<16x128xf32>
    %27 = arith.mulf %26, %25 : vector<16x128xf32>
    %28 = math.exp %27 : vector<16x128xf32>
    %cst_12 = arith.constant 2.000000e+00 : f32
    %29 = vector.broadcast %cst_12 : f32 to vector<16x128xf32>
    %30 = arith.mulf %29, %21 : vector<16x128xf32>
    %31 = math.exp %30 : vector<16x128xf32>
    %cst_13 = arith.constant 1.000000e+00 : f32
    %32 = vector.broadcast %cst_13 : f32 to vector<16x128xf32>
    %33 = arith.cmpf oeq, %4, %32 : vector<16x128xf32>
    %34 = arith.mulf %28, %21 : vector<16x128xf32>
    %cst_14 = arith.constant 0.000000e+00 : f32
    %35 = vector.broadcast %cst_14 : f32 to vector<16x128xf32>
    %36 = arith.select %33, %34, %35 : vector<16x128xi1>, vector<16x128xf32>
    %cst_15 = arith.constant 0.000000e+00 : f32
    %37 = vector.broadcast %cst_15 : f32 to vector<16x128xf32>
    %38 = arith.cmpf oeq, %4, %37 : vector<16x128xf32>
    %39 = arith.mulf %31, %17 : vector<16x128xf32>
    %cst_16 = arith.constant 0.000000e+00 : f32
    %40 = vector.broadcast %cst_16 : f32 to vector<16x128xf32>
    %41 = arith.select %38, %39, %40 : vector<16x128xi1>, vector<16x128xf32>
    %c0_17 = arith.constant 0 : index
    %c0_18 = arith.constant 0 : index
    %42 = vector.load %arg5[%c0_17, %c0_18] : memref<16x128xf32, #tpu.memory_space<vmem>>, vector<16x128xf32>
    %43 = arith.addf %42, %36 : vector<16x128xf32>
    %c0_19 = arith.constant 0 : index
    %c0_20 = arith.constant 0 : index
    %44 = vector.load %arg5[%c0_19, %c0_20] : memref<16x128xf32, #tpu.memory_space<vmem>>, vector<16x128xf32>
    tpu.vector_store %arg5[%c0_19, %c0_20], %43 {strides = array<i32>} : memref<16x128xf32, #tpu.memory_space<vmem>>, vector<16x128xf32>,
    %c0_21 = arith.constant 0 : index
    %c0_22 = arith.constant 0 : index
    %45 = vector.load %arg6[%c0_21, %c0_22] : memref<16x128xf32, #tpu.memory_space<vmem>>, vector<16x128xf32>
    %46 = arith.addf %45, %41 : vector<16x128xf32>
    %c0_23 = arith.constant 0 : index
    %c0_24 = arith.constant 0 : index
    %47 = vector.load %arg6[%c0_23, %c0_24] : memref<16x128xf32, #tpu.memory_space<vmem>>, vector<16x128xf32>
    tpu.vector_store %arg6[%c0_23, %c0_24], %46 {strides = array<i32>} : memref<16x128xf32, #tpu.memory_space<vmem>>, vector<16x128xf32>,
    %c0_i32_25 = arith.constant 0 : i32
    %48 = arith.cmpi eq, %arg1, %c0_i32_25 : i32
    %49 = arith.extui %48 : i1 to i32
    %c0_i32_26 = arith.constant 0 : i32
    %50 = arith.cmpi ne, %49, %c0_i32_26 : i32
    scf.if %50 {
      %c0_27 = arith.constant 0 : index
      %c0_28 = arith.constant 0 : index
      %51 = vector.load %arg5[%c0_27, %c0_28] : memref<16x128xf32, #tpu.memory_space<vmem>>, vector<16x128xf32>
      %c0_29 = arith.constant 0 : index
      %c0_30 = arith.constant 0 : index
      %c0_31 = arith.constant 0 : index
      %52 = vector.load %arg4[%c0_29, %c0_30, %c0_31] : memref<2x16x128xf32, #tpu.memory_space<vmem>>, vector<1x16x128xf32>
      %53 = vector.shape_cast %52 : vector<1x16x128xf32> to vector<16x128xf32>
      %54 = vector.shape_cast %51 : vector<16x128xf32> to vector<1x16x128xf32>
      tpu.vector_store %arg4[%c0_29, %c0_30, %c0_31], %54 {strides = array<i32>} : memref<2x16x128xf32, #tpu.memory_space<vmem>>, vector<1x16x128xf32>,
      %c0_32 = arith.constant 0 : index
      %c0_33 = arith.constant 0 : index
      %55 = vector.load %arg6[%c0_32, %c0_33] : memref<16x128xf32, #tpu.memory_space<vmem>>, vector<16x128xf32>
      %c1 = arith.constant 1 : index
      %c0_34 = arith.constant 0 : index
      %c0_35 = arith.constant 0 : index
      %56 = vector.load %arg4[%c1, %c0_34, %c0_35] : memref<2x16x128xf32, #tpu.memory_space<vmem>>, vector<1x16x128xf32>
      %57 = vector.shape_cast %56 : vector<1x16x128xf32> to vector<16x128xf32>
      %58 = vector.shape_cast %55 : vector<16x128xf32> to vector<1x16x128xf32>
      tpu.vector_store %arg4[%c1, %c0_34, %c0_35], %58 {strides = array<i32>} : memref<2x16x128xf32, #tpu.memory_space<vmem>>, vector<1x16x128xf32>,
    } else {
    }
    return
  }
  func.func @transform_0(%arg0: i32, %arg1: i32) -> (i32, i32) {
    %c1_i32 = arith.constant 1 : i32
    %0 = arith.muli %arg0, %c1_i32 : i32
    %1 = arith.addi %0, %arg1 : i32
    %c0_i32 = arith.constant 0 : i32
    %2 = arith.minsi %1, %c0_i32 : i32
    %c0_i32_0 = arith.constant 0 : i32
    %c0_i32_1 = arith.constant 0 : i32
    return %2, %c0_i32_0 : i32, i32
  }
  func.func @transform_1(%arg0: i32, %arg1: i32) -> (i32, i32) {
    %c1_i32 = arith.constant 1 : i32
    %0 = arith.muli %arg0, %c1_i32 : i32
    %1 = arith.addi %0, %arg1 : i32
    %c0_i32 = arith.constant 0 : i32
    %2 = arith.minsi %1, %c0_i32 : i32
    %c0_i32_0 = arith.constant 0 : i32
    %c0_i32_1 = arith.constant 0 : i32
    return %2, %c0_i32_0 : i32, i32
  }
  func.func @transform_2(%arg0: i32, %arg1: i32) -> (i32, i32, i32) {
    %c0_i32 = arith.constant 0 : i32
    %c0_i32_0 = arith.constant 0 : i32
    %c0_i32_1 = arith.constant 0 : i32
    return %arg0, %c0_i32, %c0_i32_0 : i32, i32, i32
  }
}

</mosaic_0001>

<bundles_post_ra>
// kernel: binary_focal_loss.1
= control target key start
LH: loop header
LB: loop body
LE: loop exit
PB: predicated region body
PF: predicated region fallthrough
CT: control target
= control target key end

     0   :  { %s252_s0 = inlined_call_operand.vmem [shape: f32[16,128], index: 0, kind: input, shape index: {}]   ;;  %s253_s1 = inlined_call_operand.vmem [shape: f32[16,128], index: 1, kind: input, shape index: {}]   ;;  %s254_s2 = inlined_call_operand.vmem [shape: f32[2,16,128], index: 2, kind: output, shape index: {}]  }
   0x1   :  { %v83_v0 = vld [vmem:[%s252_s0] sm:$0xff]  ;;  %v84_v1 = vld [vmem:[%s252_s0 + $0x8] sm:$0xff] }
   0x2   :  { %v87_v2 = vand.u32 2147483647, %v83_v0  ;;  %v88_v3 = vand.u32 2147483647, %v84_v1  ;;  %v117_v16 = vmax.f32 %v83_v0, 0.0  ;;  %v118_v19 = vmax.f32 %v84_v1, 0.0 }
   0x3   :  { %v113_v22 = vmin.f32 %v83_v0, 0.0  ;;  %v114_v27 = vmin.f32 %v84_v1, 0.0  ;;  %v85_v52 = vld [vmem:[%s253_s1] sm:$0xff]  ;;  %v86_v53 = vld [vmem:[%s253_s1 + $0x8] sm:$0xff] }
   0x4   :  { %v89_v4 = vsub.f32 0.0, %v87_v2  ;;  %v90_v5 = vsub.f32 0.0, %v88_v3  ;;  %v119_v23 = vsub.f32 0.0, %v117_v16  ;;  %v120_v28 = vsub.f32 0.0, %v118_v19 }
   0x5   :  { %vm143_vm2 = vcmp.eq.f32.partialorder %v85_v52, 1.0  ;;  %vm149_vm3 = vcmp.eq.f32.partialorder %v85_v52, 0.0  ;;  %vm144_vm4 = vcmp.eq.f32.partialorder %v86_v53, 1.0  ;;  %vm150_vm5 = vcmp.eq.f32.partialorder %v86_v53, 0.0 }
   0x6   :  { %v91_v6 = vmul.f32 1.442695, %v89_v4  ;;  %v93_v7 = vmul.f32 1.442695, %v90_v5 }
   0x8   :  { %197 = vpow2.f32 %v91_v6 }
   0x9   :  { %199 = vpow2.f32 %v93_v7 }
  0x12   :  { %v198_v8 = vpop.eup %197 }
  0x13   :  { %v200_v9 = vpop.eup %199  ;;  %v95_v10 = vadd.f32 1.0, %v198_v8  ;;  %v98_v12 = vmul.f32 -0.5, %v198_v8  ;;  %v101_v15 = vand.u32 2147483647, %v198_v8 }
  0x14   :  { %v104_v11 = vadd.f32 1.0, %v200_v9  ;;  %v107_v13 = vmul.f32 -0.5, %v200_v9  ;;  %v110_v18 = vand.u32 2147483647, %v200_v9 }
  0x15   :  { %201 = vlog2.f32 %v95_v10  ;;  %v99_v14 = vadd.f32 1.0, %v98_v12  ;;  %vm102_vm0 = vcmp.lt.f32.partialorder %v101_v15, 0.0004427343 }
  0x16   :  { %203 = vlog2.f32 %v104_v11  ;;  %v108_v17 = vadd.f32 1.0, %v107_v13  ;;  %vm111_vm1 = vcmp.lt.f32.partialorder %v110_v18, 0.0004427343 }
  0x17   :  { %v100_v20 = vmul.f32 %v198_v8, %v99_v14 }
  0x18   :  { %v109_v24 = vmul.f32 %v200_v9, %v108_v17 }
  0x1f   :  { %v202_v21 = vpop.eup %201 }
  0x20   :  { %v204_v25 = vpop.eup %203  ;;  %v97_v26 = vmul.f32 0.6931472, %v202_v21 }
  0x21   :  { %v106_v29 = vmul.f32 0.6931472, %v204_v25 }
  0x22   :  { %v103_v30 = vsel %vm102_vm0, %v100_v20, %v97_v26 }
  0x23   :  { %v115_v31 = vsub.f32 %v113_v22, %v103_v30  ;;  %v121_v32 = vsub.f32 %v119_v23, %v103_v30  ;;  %v112_v33 = vsel %vm111_vm1, %v109_v24, %v106_v29 }
  0x24   :  { %v116_v34 = vsub.f32 %v114_v27, %v112_v33  ;;  %v122_v35 = vsub.f32 %v120_v28, %v112_v33 }
  0x25   :  { %v123_v36 = vmax.f32 %v115_v31, -13.815511  ;;  %v127_v37 = vmax.f32 %v121_v32, -13.815511 }
  0x26   :  { %v124_v38 = vmax.f32 %v116_v34, -13.815511  ;;  %v128_v39 = vmax.f32 %v122_v35, -13.815511 }
  0x27   :  { %v125_v40 = vmin.f32 %v123_v36, -1.0000005e-06  ;;  %v129_v41 = vmin.f32 %v127_v37, -1.0000005e-06 }
  0x28   :  { %v126_v42 = vmin.f32 %v124_v38, -1.0000005e-06  ;;  %v130_v43 = vmin.f32 %v128_v39, -1.0000005e-06 }
  0x29   :  { %v131_v44 = vmul.f32 2.0, %v129_v41  ;;  %v137_v45 = vmul.f32 2.0, %v125_v40 }
  0x2a   :  { %v132_v46 = vmul.f32 2.0, %v130_v43  ;;  %v138_v47 = vmul.f32 2.0, %v126_v42 }
  0x2b   :  { %v133_v48 = vmul.f32 1.442695, %v131_v44  ;;  %v139_v49 = vmul.f32 1.442695, %v137_v45 }
  0x2c   :  { %v135_v50 = vmul.f32 1.442695, %v132_v46  ;;  %v141_v51 = vmul.f32 1.442695, %v138_v47 }
  0x2d   :  { %205 = vpow2.f32 %v133_v48 }
  0x2e   :  { %207 = vpow2.f32 %v139_v49 }
  0x2f   :  { %209 = vpow2.f32 %v135_v50 }
  0x30   :  { %211 = vpow2.f32 %v141_v51 }
  0x37   :  { %v206_v54 = vpop.eup %205 }
  0x38   :  { %v208_v55 = vpop.eup %207  ;;  %v145_v56 = vmul.f32 %v206_v54, %v125_v40 }
  0x39   :  { %v210_v57 = vpop.eup %209  ;;  %v151_v58 = vmul.f32 %v208_v55, %v121_v32 }
  0x3a   :  { %v212_v59 = vpop.eup %211  ;;  %v147_v60 = vsel %vm143_vm2, %v145_v56, 0.0  ;;  %v146_v61 = vmul.f32 %v210_v57, %v126_v42 }
  0x3b   :  { %172 = vst [vmem:[%s254_s2] sm:$0xff] %v147_v60  ;;  %v153_v62 = vsel %vm149_vm3, %v151_v58, 0.0  ;;  %v152_v63 = vmul.f32 %v212_v59, %v122_v35 }
  0x3c   :  { %v148_v0 = vsel %vm144_vm4, %v146_v61, 0.0  ;;  %195 = vst [vmem:[%s254_s2 + $0x10] sm:$0xff] %v153_v62 }
  0x3d   :  { %173 = vst [vmem:[%s254_s2 + $0x8] sm:$0xff] %v148_v0  ;;  %v154_v1 = vsel %vm150_vm5, %v152_v63, 0.0 }
  0x3e   :  { %196 = vst [vmem:[%s254_s2 + $0x18] sm:$0xff] %v154_v1 }

</bundles_post_ra>
